<compile_context>
chip_gen: v6e
topology: v6e:2x2x1
jax: 0.10.0
libtpu: 0.0.40
codegen_flags: <defaults>
</compile_context>

<pallas_src>
import jax
import jax.numpy as jnp
from jax.experimental import pallas as pl
from jax.experimental.pallas import tpu as pltpu


def _round_up(n, m):
    return ((n + m - 1) // m) * m


def _num_batch_tiles():
    """Grid length per TPU generation: 2 parallel tiles on v7x (2 TCs/chip),
    one big tile on single-TC v5e/v6e (extra grid steps are pure overhead)."""
    try:
        kind = jax.devices()[0].device_kind.lower()
    except Exception:
        return 1
    return 2 if "v7" in kind else 1


def _vmem_limit_bytes(tb, d, hp, cp):
    """Scoped-VMEM limit derived from the real footprint (+ generous margin)."""
    resident = (d * hp + hp * cp) * 2 + (hp + cp) * 4          # bf16 W, f32 b (x2 buf below)
    pipelined = 2 * (tb * d * 4) + 2 * (tb * cp * 4)           # double-buffered x / out tiles
    intermediate = tb * hp * 4                                 # f32 hidden activations
    return max(2 * (resident + pipelined + intermediate) + (4 << 20), 8 << 20)


def mlp_kernel(x_ref, w1_ref, b1_ref, w2_ref, b2_ref, o_ref):
    # fc1: [TB, D](f32 -> bf16) @ [D, Hp](bf16) -> f32 accumulator on the MXU.
    x = x_ref[...].astype(jnp.bfloat16)
    h = jnp.dot(x, w1_ref[...], preferred_element_type=jnp.float32)
    # Bias add + ReLU in f32 on the VPU.
    h = jnp.maximum(h + b1_ref[...], 0.0)
    # fc2: [TB, Hp](bf16) @ [Hp, Cp](bf16) -> f32 accumulator.
    out = jnp.dot(h.astype(jnp.bfloat16), w2_ref[...],
                  preferred_element_type=jnp.float32)
    o_ref[...] = (out + b2_ref[...]).astype(o_ref.dtype)


def prepare_params(w1, b1, w2, b2):
    """One-time prep (hoisted out of the forward): pad H / C to 128-lane
    multiples (padding lanes are exactly zero so ReLU / fc2 / sliced-off output
    columns pick up no garbage) and cast weights to bf16, biases to f32."""
    D, H = w1.shape
    C = w2.shape[1]
    Hp = _round_up(H, 128)
    Cp = _round_up(C, 128)
    w1p = jnp.pad(w1, ((0, 0), (0, Hp - H))).astype(jnp.bfloat16)   # [D,  Hp]
    b1p = jnp.pad(b1, ((0, 0), (0, Hp - H))).astype(jnp.float32)    # [1,  Hp]
    w2p = jnp.pad(w2, ((0, Hp - H), (0, Cp - C))).astype(jnp.bfloat16)  # [Hp, Cp]
    b2p = jnp.pad(b2, ((0, 0), (0, Cp - C))).astype(jnp.float32)    # [1,  Cp]
    return w1p, b1p, w2p, b2p


def mnistnet_forward(x, w1p, b1p, w2p, b2p, num_classes, *, num_tiles=None):
    """x: [B, D] float32; padded params from prepare_params(). Returns [B, C] f32."""
    B, D = x.shape
    Hp = w1p.shape[1]
    Cp = w2p.shape[1]

    if num_tiles is None:
        num_tiles = _num_batch_tiles()

    # Batch tile: multiple of 16 (bf16 sublane packing), sized to minimize
    # batch padding for the chosen number of tiles.
    TB = _round_up(pl.cdiv(B, num_tiles), 16)
    Bp = TB * num_tiles
    if Bp > B:
        x = jnp.pad(x, ((0, Bp - B), (0, 0)))

    cost = pl.CostEstimate(
        flops=2 * Bp * D * Hp + 2 * Bp * Hp * Cp,
        transcendentals=0,
        bytes_accessed=(Bp * D * 4 + (D * Hp + Hp * Cp) * 2
                        + (Hp + Cp) * 4 + Bp * Cp * 4),
    )

    out_padded = pl.pallas_call(
        mlp_kernel,
        out_shape=jax.ShapeDtypeStruct((Bp, Cp), jnp.float32),
        grid=(num_tiles,),
        in_specs=[
            # Batch-tiled activations; last dim == full array dim (legal for D<128).
            pl.BlockSpec((TB, D), lambda i: (i, 0)),
            # Weights / biases: constant block index -> resident in VMEM, DMA'd once.
            pl.BlockSpec((D, Hp), lambda i: (0, 0)),
            pl.BlockSpec((1, Hp), lambda i: (0, 0)),
            pl.BlockSpec((Hp, Cp), lambda i: (0, 0)),
            pl.BlockSpec((1, Cp), lambda i: (0, 0)),
        ],
        out_specs=pl.BlockSpec((TB, Cp), lambda i: (i, 0)),
        compiler_params=pltpu.CompilerParams(
            # Independent batch tiles: sharded across v7x's 2 TCs when grid=2;
            # no-op for the single-tile grid on v5e/v6e.
            dimension_semantics=("parallel",),
            vmem_limit_bytes=_vmem_limit_bytes(TB, D, Hp, Cp),
        ),
        cost_estimate=cost,
    )(x, w1p, b1p, w2p, b2p)

    # Slice back to the logical [B, num_classes] shape (module semantics).
    return out_padded[:B, :num_classes]


def init_params(key, input_size, hidden_size, num_classes, dtype=jnp.float32):
    """Deterministic init mirroring torch.nn.Linear's U(-1/sqrt(in), 1/sqrt(in))."""
    k1, k2, k3, k4 = jax.random.split(key, 4)
    bound1 = 1.0 / (input_size ** 0.5)
    bound2 = 1.0 / (hidden_size ** 0.5)
    # Stored as [in, out] (transposed relative to PyTorch's [out, in]).
    w1 = jax.random.uniform(k1, (input_size, hidden_size), dtype,
                            minval=-bound1, maxval=bound1)
    b1 = jax.random.uniform(k2, (1, hidden_size), dtype,
                            minval=-bound1, maxval=bound1)
    w2 = jax.random.uniform(k3, (hidden_size, num_classes), dtype,
                            minval=-bound2, maxval=bound2)
    b2 = jax.random.uniform(k4, (1, num_classes), dtype,
                            minval=-bound2, maxval=bound2)
    return w1, b1, w2, b2


if __name__ == "__main__":
    # Small shapes consistent with the module; B=256 fills the MXU nicely
    # (one 256-row tile on v5e/v6e, two 128-row parallel tiles on v7x).
    B, D_IN, HID, NCLS = 256, 64, 32, 16

    key = jax.random.PRNGKey(0)
    kx, kp = jax.random.split(key)
    x = jax.random.normal(kx, (B, D_IN), jnp.float32)
    w1, b1, w2, b2 = init_params(kp, D_IN, HID, NCLS)

    # One-time param prep (pad + bf16 cast), hoisted out of the per-call forward.
    padded_params = prepare_params(w1, b1, w2, b2)
    padded_params = jax.tree_util.tree_map(jax.block_until_ready, padded_params)

    fwd = jax.jit(
        lambda x_, p: mnistnet_forward(x_, *p, num_classes=NCLS,
                                       num_tiles=_num_batch_tiles()))
    out = fwd(x, padded_params)
    out = jax.block_until_ready(out)

    # Pure-JAX f32 reference; tolerance loosened for bf16 matmul inputs.
    ref = jnp.maximum(x @ w1 + b1, 0.0) @ w2 + b2
    assert out.shape == (B, NCLS)
    err = float(jnp.max(jnp.abs(out - ref)))
    assert jnp.allclose(out, ref, atol=5e-2, rtol=5e-2), f"max abs err {err}"

    print("KERNEL_OK")
</pallas_src>

<mosaic_0001>
module attributes {stable_mosaic.version = 11 : i64} {
  func.func @mlp_kernel(%arg0: i32, %arg1: memref<256x64xf32, #tpu.memory_space<vmem>>, %arg2: memref<64x128xbf16, #tpu.memory_space<vmem>>, %arg3: memref<1x128xf32, #tpu.memory_space<vmem>>, %arg4: memref<128x128xbf16, #tpu.memory_space<vmem>>, %arg5: memref<1x128xf32, #tpu.memory_space<vmem>>, %arg6: memref<256x128xf32, #tpu.memory_space<vmem>>) attributes {dimension_semantics = [#tpu.dimension_semantics<parallel>], iteration_bounds = array<i64: 1>, scalar_prefetch = 0 : i64, scratch_operands = 0 : i64, tpu.core_type = #tpu.core_type<tc>, window_params = [{transform_indices = @transform_0, window_bounds = array<i64: 256, 64>}, {pipeline_mode = #tpu.pipeline_mode<synchronous>, transform_indices = @transform_1, window_bounds = array<i64: 64, 128>}, {pipeline_mode = #tpu.pipeline_mode<synchronous>, transform_indices = @transform_2, window_bounds = array<i64: 1, 128>}, {pipeline_mode = #tpu.pipeline_mode<synchronous>, transform_indices = @transform_3, window_bounds = array<i64: 128, 128>}, {pipeline_mode = #tpu.pipeline_mode<synchronous>, transform_indices = @transform_4, window_bounds = array<i64: 1, 128>}, {transform_indices = @transform_5, window_bounds = array<i64: 256, 128>}]} {
    %c0 = arith.constant 0 : index
    %c0_0 = arith.constant 0 : index
    %0 = vector.load %arg1[%c0, %c0_0] : memref<256x64xf32, #tpu.memory_space<vmem>>, vector<256x64xf32>
    %1 = arith.truncf %0 : vector<256x64xf32> to vector<256x64xbf16>
    %c0_1 = arith.constant 0 : index
    %c0_2 = arith.constant 0 : index
    %2 = vector.load %arg2[%c0_1, %c0_2] : memref<64x128xbf16, #tpu.memory_space<vmem>>, vector<64x128xbf16>
    %cst = arith.constant dense<0.000000e+00> : vector<256x128xf32>
    %3 = tpu.matmul %1, %2, %cst {dimension_numbers = #tpu.dot_dimension_numbers<[1], [0], [0], [1], [0, 0, 1, 1], [], []>} : vector<256x64xbf16>, vector<64x128xbf16>, vector<256x128xf32> -> vector<256x128xf32>
    %c0_3 = arith.constant 0 : index
    %c0_4 = arith.constant 0 : index
    %4 = vector.load %arg3[%c0_3, %c0_4] : memref<1x128xf32, #tpu.memory_space<vmem>>, vector<1x128xf32>
    %5 = vector.broadcast %4 : vector<1x128xf32> to vector<256x128xf32>
    %6 = arith.addf %3, %5 : vector<256x128xf32>
    %cst_5 = arith.constant 0.000000e+00 : f32
    %7 = vector.broadcast %cst_5 : f32 to vector<256x128xf32>
    %8 = arith.maximumf %6, %7 : vector<256x128xf32>
    %9 = arith.truncf %8 : vector<256x128xf32> to vector<256x128xbf16>
    %c0_6 = arith.constant 0 : index
    %c0_7 = arith.constant 0 : index
    %10 = vector.load %arg4[%c0_6, %c0_7] : memref<128x128xbf16, #tpu.memory_space<vmem>>, vector<128x128xbf16>
    %cst_8 = arith.constant dense<0.000000e+00> : vector<256x128xf32>
    %11 = tpu.matmul %9, %10, %cst_8 {dimension_numbers = #tpu.dot_dimension_numbers<[1], [0], [0], [1], [0, 0, 1, 1], [], []>} : vector<256x128xbf16>, vector<128x128xbf16>, vector<256x128xf32> -> vector<256x128xf32>
    %c0_9 = arith.constant 0 : index
    %c0_10 = arith.constant 0 : index
    %12 = vector.load %arg5[%c0_9, %c0_10] : memref<1x128xf32, #tpu.memory_space<vmem>>, vector<1x128xf32>
    %13 = vector.broadcast %12 : vector<1x128xf32> to vector<256x128xf32>
    %14 = arith.addf %11, %13 : vector<256x128xf32>
    %c0_11 = arith.constant 0 : index
    %c0_12 = arith.constant 0 : index
    %15 = vector.load %arg6[%c0_11, %c0_12] : memref<256x128xf32, #tpu.memory_space<vmem>>, vector<256x128xf32>
    tpu.vector_store %arg6[%c0_11, %c0_12], %14 {strides = array<i32>} : memref<256x128xf32, #tpu.memory_space<vmem>>, vector<256x128xf32>,
    return
  }
  func.func @transform_0(%arg0: i32) -> (i32, i32) {
    %c0_i32 = arith.constant 0 : i32
    %c0_i32_0 = arith.constant 0 : i32
    return %arg0, %c0_i32 : i32, i32
  }
  func.func @transform_1(%arg0: i32) -> (i32, i32) {
    %c0_i32 = arith.constant 0 : i32
    %c0_i32_0 = arith.constant 0 : i32
    %c0_i32_1 = arith.constant 0 : i32
    return %c0_i32, %c0_i32_0 : i32, i32
  }
  func.func @transform_2(%arg0: i32) -> (i32, i32) {
    %c0_i32 = arith.constant 0 : i32
    %c0_i32_0 = arith.constant 0 : i32
    %c0_i32_1 = arith.constant 0 : i32
    return %c0_i32, %c0_i32_0 : i32, i32
  }
  func.func @transform_3(%arg0: i32) -> (i32, i32) {
    %c0_i32 = arith.constant 0 : i32
    %c0_i32_0 = arith.constant 0 : i32
    %c0_i32_1 = arith.constant 0 : i32
    return %c0_i32, %c0_i32_0 : i32, i32
  }
  func.func @transform_4(%arg0: i32) -> (i32, i32) {
    %c0_i32 = arith.constant 0 : i32
    %c0_i32_0 = arith.constant 0 : i32
    %c0_i32_1 = arith.constant 0 : i32
    return %c0_i32, %c0_i32_0 : i32, i32
  }
  func.func @transform_5(%arg0: i32) -> (i32, i32) {
    %c0_i32 = arith.constant 0 : i32
    %c0_i32_0 = arith.constant 0 : i32
    return %arg0, %c0_i32 : i32, i32
  }
}

</mosaic_0001>

<bundles_post_ra>
// kernel: _lambda_.1
= control target key start
LH: loop header
LB: loop body
LE: loop exit
PB: predicated region body
PF: predicated region fallthrough
CT: control target
= control target key end

     0   :  { %vm108_vm0 = vcmask 523264   ;;  %s1172_s1 = inlined_call_operand.vmem [shape: bf16[64,128], index: 1, kind: input, shape index: {}]   ;;  %s1173_s0 = inlined_call_operand.vmem [shape: f32[256,64], index: 0, kind: input, shape index: {}]   ;;  %s1174_s3 = inlined_call_operand.vmem [shape: bf16[128,128], index: 3, kind: input, shape index: {}]   ;;  %s1175_s2 = inlined_call_operand.vmem [shape: f32[1,128], index: 2, kind: input, shape index: {}]   ;;  %s1176_s4 = inlined_call_operand.vmem [shape: f32[1,128], index: 4, kind: input, shape index: {}]   ;;  %s1177_s5 = inlined_call_operand.vmem [shape: f32[256,128], index: 5, kind: output, shape index: {}]  }
   0x1   :  { %v812_v0 = vld [vmem:[%s1172_s1 + $0x18] sm:$0xff]   ;;  %v813_v1 = vld [vmem:[%s1172_s1 + $0x10] sm:$0xff]   ;;  %v814_v2 = vld [vmem:[%s1172_s1 + $0x8] sm:$0xff]  }
   0x2   :  { %708 = vmatprep.subr.bf16.mxu0 %v812_v0  ;;  %v21_v3 = vld [vmem:[%s1173_s0] sm:$0xff]  ;;  %v22_v4 = vld [vmem:[%s1173_s0 + $0x8] sm:$0xff]  ;;  %v23_v7 = vld [vmem:[%s1173_s0 + $0x10] sm:$0xff] }
   0x3   :  { %709 = vmatpush3.bf16.msra.mxu0 %v812_v0  ;;  %v53_v5 = vpack.c.bf16 %v22_v4, %v21_v3  ;;  %v815_v6 = vld [vmem:[%s1172_s1] sm:$0xff]   ;;  %v24_v8 = vld [vmem:[%s1173_s0 + $0x18] sm:$0xff]  ;;  %v26_v10 = vld [vmem:[%s1173_s0 + $0x28] sm:$0xff] }
   0x4   :  { %710 = vmatprep.subr.bf16.mxu0 %v813_v1  ;;  %v25_v9 = vld [vmem:[%s1173_s0 + $0x20] sm:$0xff]  ;;  %v54_v11 = vpack.c.bf16 %v24_v8, %v23_v7  ;;  %v816_v13 = vld [vmem:[%s1174_s3 + $0x38] sm:$0xff]   ;;  %v817_v14 = vld [vmem:[%s1174_s3 + $0x30] sm:$0xff]  }
   0x5   :  { %716 = vmatprep.mubr.msk.bf16.mxu0 %vm108_vm0, %v53_v5  ;;  %v55_v12 = vpack.c.bf16 %v26_v10, %v25_v9  ;;  %v27_v15 = vld [vmem:[%s1173_s0 + $0x30] sm:$0xff]  ;;  %v28_v16 = vld [vmem:[%s1173_s0 + $0x38] sm:$0xff]  ;;  %796 = vmatprep.subr.bf16.mxu1 %v816_v13  ;;  %v29_v17 = vld [vmem:[%s1173_s0 + $0x40] sm:$0xff] }
   0x6   :  { %v30_v18 = vld [vmem:[%s1173_s0 + $0x48] sm:$0xff]  ;;  %804 = vmatpush3.bf16.msra.mxu1 %v816_v13  ;;  %v56_v20 = vpack.c.bf16 %v28_v16, %v27_v15  ;;  %v819_v22 = vld [vmem:[%s1174_s3 + $0x20] sm:$0xff]   ;;  %v31_v23 = vld [vmem:[%s1173_s0 + $0x50] sm:$0xff] }
   0x7   :  { %711 = vmatpush3.bf16.msra.mxu0 %v813_v1  ;;  %v818_v19 = vld [vmem:[%s1174_s3 + $0x28] sm:$0xff]   ;;  %797 = vmatprep.subr.bf16.mxu1 %v817_v14  ;;  %v57_v21 = vpack.c.bf16 %v30_v18, %v29_v17  ;;  %v32_v24 = vld [vmem:[%s1173_s0 + $0x58] sm:$0xff]  ;;  %v33_v25 = vld [vmem:[%s1173_s0 + $0x60] sm:$0xff] }
   0x8   :  { %712 = vmatprep.subr.bf16.mxu0 %v814_v2  ;;  %v34_v26 = vld [vmem:[%s1173_s0 + $0x68] sm:$0xff]  ;;  %v820_v27 = vld [vmem:[%s1174_s3 + $0x18] sm:$0xff]   ;;  %v58_v28 = vpack.c.bf16 %v32_v24, %v31_v23  ;;  %v35_v30 = vld [vmem:[%s1173_s0 + $0x70] sm:$0xff] }
   0x9   :  { %v59_v29 = vpack.c.bf16 %v34_v26, %v33_v25  ;;  %v36_v31 = vld [vmem:[%s1173_s0 + $0x78] sm:$0xff]  ;;  %v37_v32 = vld [vmem:[%s1173_s0 + $0x80] sm:$0xff]  ;;  %v38_v33 = vld [vmem:[%s1173_s0 + $0x88] sm:$0xff] }
   0xa   :  { %805 = vmatpush3.bf16.msra.mxu1 %v817_v14  ;;  %v60_v34 = vpack.c.bf16 %v36_v31, %v35_v30  ;;  %v61_v35 = vpack.c.bf16 %v38_v33, %v37_v32  ;;  %v39_v36 = vld [vmem:[%s1173_s0 + $0x90] sm:$0xff]  ;;  %v40_v37 = vld [vmem:[%s1173_s0 + $0x98] sm:$0xff]  ;;  %v41_v38 = vld [vmem:[%s1173_s0 + $0xa0] sm:$0xff] }
   0xb   :  { %713 = vmatpush3.bf16.msra.mxu0 %v814_v2  ;;  %798 = vmatprep.subr.bf16.mxu1 %v818_v19  ;;  %v42_v39 = vld [vmem:[%s1173_s0 + $0xa8] sm:$0xff]  ;;  %v62_v40 = vpack.c.bf16 %v40_v37, %v39_v36  ;;  %v43_v42 = vld [vmem:[%s1173_s0 + $0xb0] sm:$0xff]  ;;  %v44_v43 = vld [vmem:[%s1173_s0 + $0xb8] sm:$0xff] }
   0xc   :  { %714 = vmatprep.subr.bf16.mxu0 %v815_v6  ;;  %v63_v41 = vpack.c.bf16 %v42_v39, %v41_v38  ;;  %v45_v44 = vld [vmem:[%s1173_s0 + $0xc0] sm:$0xff]  ;;  %v46_v45 = vld [vmem:[%s1173_s0 + $0xc8] sm:$0xff]  ;;  %v64_v46 = vpack.c.bf16 %v44_v43, %v43_v42  ;;  %v47_v48 = vld [vmem:[%s1173_s0 + $0xd0] sm:$0xff] }
   0xd   :  { %v65_v47 = vpack.c.bf16 %v46_v45, %v45_v44  ;;  %v48_v49 = vld [vmem:[%s1173_s0 + $0xd8] sm:$0xff]  ;;  %v49_v50 = vld [vmem:[%s1173_s0 + $0xe0] sm:$0xff]  ;;  %v50_v51 = vld [vmem:[%s1173_s0 + $0xe8] sm:$0xff] }
   0xe   :  { %806 = vmatpush3.bf16.msra.mxu1 %v818_v19  ;;  %v66_v52 = vpack.c.bf16 %v48_v49, %v47_v48  ;;  %v67_v53 = vpack.c.bf16 %v50_v51, %v49_v50  ;;  %v51_v54 = vld [vmem:[%s1173_s0 + $0xf0] sm:$0xff]  ;;  %v52_v55 = vld [vmem:[%s1173_s0 + $0xf8] sm:$0xff]  ;;  %v822_v58 = vld [vmem:[%s1174_s3 + $0x8] sm:$0xff]  }
   0xf   :  { %715 = vmatpush3.bf16.msra.mxu0 %v815_v6  ;;  %799 = vmatprep.subr.bf16.mxu1 %v819_v22  ;;  %v68_v56 = vpack.c.bf16 %v52_v55, %v51_v54  ;;  %v821_v57 = vld [vmem:[%s1174_s3 + $0x10] sm:$0xff]   ;;  %v823_v59 = vld [vmem:[%s1174_s3] sm:$0xff]  }
  0x10   :  { %748 = vmatprep.subr.bf16.mxu0 %v816_v13  ;;  %v1005_v62 = vld [vmem:[%s1175_s2] ss:$0 sm:$0xff] }
  0x12   :  { %717 = vmatmul.mubr.msk.bf16.vlgmr.msra.gmra.mxu0 %vm108_vm0, %v54_v11  ;;  %807 = vmatpush3.bf16.msra.mxu1 %v819_v22 }
  0x13   :  { %720 = vmatprep.mubr.msk.bf16.mxu0 %vm108_vm0, %v55_v12  ;;  %749 = vmatpush3.bf16.msra.mxu0 %v816_v13 }
  0x14   :  { %750 = vmatprep.subr.bf16.mxu0 %v817_v14  ;;  %800 = vmatprep.subr.bf16.mxu1 %v820_v27 }
  0x16   :  { %808 = vmatpush3.bf16.msra.mxu1 %v820_v27 }
  0x17   :  { %751 = vmatpush3.bf16.msra.mxu0 %v817_v14  ;;  %801 = vmatprep.subr.bf16.mxu1 %v821_v57 }
  0x18   :  { %752 = vmatprep.subr.bf16.mxu0 %v818_v19 }
  0x1a   :  { %721 = vmatmul.mubr.msk.bf16.gmra.mxu0 %vm108_vm0, %v56_v20  ;;  %809 = vmatpush3.bf16.msra.mxu1 %v821_v57 }
  0x1b   :  { %724 = vmatprep.mubr.msk.bf16.mxu0 %vm108_vm0, %v57_v21  ;;  %753 = vmatpush3.bf16.msra.mxu0 %v818_v19 }
  0x1c   :  { %754 = vmatprep.subr.bf16.mxu0 %v819_v22  ;;  %802 = vmatprep.subr.bf16.mxu1 %v822_v58 }
  0x1e   :  { %810 = vmatpush3.bf16.msra.mxu1 %v822_v58 }
  0x1f   :  { %755 = vmatpush3.bf16.msra.mxu0 %v819_v22  ;;  %803 = vmatprep.subr.bf16.mxu1 %v823_v59 }
  0x20   :  { %756 = vmatprep.subr.bf16.mxu0 %v820_v27 }
  0x22   :  { %725 = vmatmul.mubr.msk.bf16.gmra.mxu0 %vm108_vm0, %v58_v28  ;;  %811 = vmatpush3.bf16.msra.mxu1 %v823_v59 }
  0x23   :  { %728 = vmatprep.mubr.msk.bf16.mxu0 %vm108_vm0, %v59_v29  ;;  %757 = vmatpush3.bf16.msra.mxu0 %v820_v27 }
  0x24   :  { %758 = vmatprep.subr.bf16.mxu0 %v821_v57 }
  0x27   :  { %759 = vmatpush3.bf16.msra.mxu0 %v821_v57 }
  0x28   :  { %760 = vmatprep.subr.bf16.mxu0 %v822_v58 }
  0x2a   :  { %729 = vmatmul.mubr.msk.bf16.gmra.mxu0 %vm108_vm0, %v60_v34 }
  0x2b   :  { %732 = vmatprep.mubr.msk.bf16.mxu0 %vm108_vm0, %v61_v35  ;;  %761 = vmatpush3.bf16.msra.mxu0 %v822_v58 }
  0x2c   :  { %762 = vmatprep.subr.bf16.mxu0 %v823_v59 }
  0x2f   :  { %763 = vmatpush3.bf16.msra.mxu0 %v823_v59 }
  0x32   :  { %733 = vmatmul.mubr.msk.bf16.gmra.mxu0 %vm108_vm0, %v62_v40 }
  0x33   :  { %736 = vmatprep.mubr.msk.bf16.mxu0 %vm108_vm0, %v63_v41 }
  0x3a   :  { %737 = vmatmul.mubr.msk.bf16.gmra.mxu0 %vm108_vm0, %v64_v46 }
  0x3b   :  { %740 = vmatprep.mubr.msk.bf16.mxu0 %vm108_vm0, %v65_v47 }
  0x42   :  { %741 = vmatmul.mubr.msk.bf16.gmra.mxu0 %vm108_vm0, %v66_v52 }
  0x43   :  { %744 = vmatprep.mubr.msk.bf16.mxu0 %vm108_vm0, %v67_v53 }
  0x4a   :  { %745 = vmatmul.mubr.msk.bf16.gmra.mxu0 %vm108_vm0, %v68_v56 }
  0xd2   :  { %v718_v60 = vpop.f32.mrf.mxu0 }
  0xd3   :  { %v200_v2 = vadd.f32 %v718_v60, %v1005_v62 }
  0xd4   :  { %v191_v61 = vpop.f32.mrf.mxu0 }
  0xd5   :  { %v192_v0 = vadd.f32 %v1005_v62, %v191_v61  ;;  %v320_v9 = vmax.f32 %v200_v2, 0.0 }
  0xd6   :  { %v719_v63 = vpop.f32.mrf.mxu0 }
  0xd7   :  { %v203_v1 = vadd.f32 %v719_v63, %v1005_v62  ;;  %v318_v7 = vmax.f32 %v192_v0, 0.0 }
  0xd8   :  { %v194_v3 = vpop.f32.mrf.mxu0 }
  0xd9   :  { %v195_v4 = vadd.f32 %v1005_v62, %v194_v3  ;;  %v321_v5 = vmax.f32 %v203_v1, 0.0 }
  0xda   :  { %v722_v6 = vpop.f32.mrf.mxu0 }
  0xdb   :  { %v319_v8 = vmax.f32 %v195_v4, 0.0  ;;  %v351_v12 = vpack.c.bf16 %v321_v5, %v320_v9  ;;  %v216_v16 = vadd.f32 %v722_v6, %v1005_v62 }
  0xdc   :  { %v207_v10 = vpop.f32.mrf.mxu0 }
  0xdd   :  { %v350_v11 = vpack.c.bf16 %v319_v8, %v318_v7  ;;  %v208_v14 = vadd.f32 %v1005_v62, %v207_v10  ;;  %v324_v23 = vmax.f32 %v216_v16, 0.0 }
  0xde   :  { %v723_v13 = vpop.f32.mrf.mxu0 }
  0xdf   :  { %v219_v15 = vadd.f32 %v723_v13, %v1005_v62  ;;  %764 = vmatprep.mubr.bf16.mxu0 %v350_v11  ;;  %v322_v21 = vmax.f32 %v208_v14, 0.0 }
  0xe0   :  { %v210_v17 = vpop.f32.mrf.mxu0  ;;  %765 = vmatmul.mubr.bf16.vlgmr.msra.gmra.mxu0 %v351_v12 }
  0xe1   :  { %v211_v18 = vadd.f32 %v1005_v62, %v210_v17  ;;  %v325_v19 = vmax.f32 %v219_v15, 0.0 }
  0xe2   :  { %v726_v20 = vpop.f32.mrf.mxu0 }
  0xe3   :  { %v323_v22 = vmax.f32 %v211_v18, 0.0  ;;  %v353_v26 = vpack.c.bf16 %v325_v19, %v324_v23  ;;  %v232_v30 = vadd.f32 %v726_v20, %v1005_v62 }
  0xe4   :  { %v223_v24 = vpop.f32.mrf.mxu0 }
  0xe5   :  { %v352_v25 = vpack.c.bf16 %v323_v22, %v322_v21  ;;  %v224_v28 = vadd.f32 %v1005_v62, %v223_v24  ;;  %v328_v37 = vmax.f32 %v232_v30, 0.0 }
  0xe6   :  { %v727_v27 = vpop.f32.mrf.mxu0 }
  0xe7   :  { %v235_v29 = vadd.f32 %v727_v27, %v1005_v62  ;;  %768 = vmatprep.mubr.bf16.mxu1 %v352_v25  ;;  %v326_v35 = vmax.f32 %v224_v28, 0.0 }
  0xe8   :  { %v226_v31 = vpop.f32.mrf.mxu0  ;;  %769 = vmatmul.mubr.bf16.vlgmr.msra.gmra.mxu1 %v353_v26 }
  0xe9   :  { %v227_v32 = vadd.f32 %v1005_v62, %v226_v31  ;;  %v329_v33 = vmax.f32 %v235_v29, 0.0 }
  0xea   :  { %v730_v34 = vpop.f32.mrf.mxu0 }
  0xeb   :  { %v327_v36 = vmax.f32 %v227_v32, 0.0  ;;  %v355_v40 = vpack.c.bf16 %v329_v33, %v328_v37  ;;  %v248_v44 = vadd.f32 %v730_v34, %v1005_v62 }
  0xec   :  { %v239_v38 = vpop.f32.mrf.mxu0 }
  0xed   :  { %v354_v39 = vpack.c.bf16 %v327_v36, %v326_v35  ;;  %v240_v42 = vadd.f32 %v1005_v62, %v239_v38  ;;  %v332_v51 = vmax.f32 %v248_v44, 0.0 }
  0xee   :  { %v731_v41 = vpop.f32.mrf.mxu0 }
  0xef   :  { %v251_v43 = vadd.f32 %v731_v41, %v1005_v62  ;;  %772 = vmatprep.mubr.bf16.mxu1 %v354_v39  ;;  %v330_v49 = vmax.f32 %v240_v42, 0.0 }
  0xf0   :  { %v242_v45 = vpop.f32.mrf.mxu0  ;;  %773 = vmatmul.mubr.bf16.gmra.mxu1 %v355_v40 }
  0xf1   :  { %v243_v46 = vadd.f32 %v1005_v62, %v242_v45  ;;  %v333_v47 = vmax.f32 %v251_v43, 0.0 }
  0xf2   :  { %v734_v48 = vpop.f32.mrf.mxu0 }
  0xf3   :  { %v331_v50 = vmax.f32 %v243_v46, 0.0  ;;  %v357_v54 = vpack.c.bf16 %v333_v47, %v332_v51  ;;  %v264_v58 = vadd.f32 %v734_v48, %v1005_v62  ;;  %v1042_v46 = vld [vmem:[%s1176_s4] ss:$0 sm:$0xff] }
  0xf4   :  { %v255_v52 = vpop.f32.mrf.mxu0 }
  0xf5   :  { %v356_v53 = vpack.c.bf16 %v331_v50, %v330_v49  ;;  %v256_v56 = vadd.f32 %v1005_v62, %v255_v52  ;;  %v336_v2 = vmax.f32 %v264_v58, 0.0 }
  0xf6   :  { %v735_v55 = vpop.f32.mrf.mxu0 }
  0xf7   :  { %v267_v57 = vadd.f32 %v735_v55, %v1005_v62  ;;  %776 = vmatprep.mubr.bf16.mxu1 %v356_v53  ;;  %v334_v0 = vmax.f32 %v256_v56, 0.0 }
  0xf8   :  { %v258_v59 = vpop.f32.mrf.mxu0  ;;  %777 = vmatmul.mubr.bf16.gmra.mxu1 %v357_v54 }
  0xf9   :  { %v259_v60 = vadd.f32 %v1005_v62, %v258_v59  ;;  %v337_v61 = vmax.f32 %v267_v57, 0.0 }
  0xfa   :  { %v738_v63 = vpop.f32.mrf.mxu0 }
  0xfb   :  { %v335_v1 = vmax.f32 %v259_v60, 0.0  ;;  %v359_v5 = vpack.c.bf16 %v337_v61, %v336_v2  ;;  %v280_v9 = vadd.f32 %v738_v63, %v1005_v62 }
  0xfc   :  { %v271_v3 = vpop.f32.mrf.mxu0 }
  0xfd   :  { %v358_v4 = vpack.c.bf16 %v335_v1, %v334_v0  ;;  %v272_v7 = vadd.f32 %v1005_v62, %v271_v3  ;;  %v340_v16 = vmax.f32 %v280_v9, 0.0 }
  0xfe   :  { %v739_v6 = vpop.f32.mrf.mxu0 }
  0xff   :  { %v283_v8 = vadd.f32 %v739_v6, %v1005_v62  ;;  %780 = vmatprep.mubr.bf16.mxu1 %v358_v4  ;;  %v338_v14 = vmax.f32 %v272_v7, 0.0 }
 0x100   :  { %v274_v10 = vpop.f32.mrf.mxu0  ;;  %781 = vmatmul.mubr.bf16.gmra.mxu1 %v359_v5 }
 0x101   :  { %v275_v11 = vadd.f32 %v1005_v62, %v274_v10  ;;  %v341_v12 = vmax.f32 %v283_v8, 0.0 }
 0x102   :  { %v742_v13 = vpop.f32.mrf.mxu0 }
 0x103   :  { %v339_v15 = vmax.f32 %v275_v11, 0.0  ;;  %v361_v19 = vpack.c.bf16 %v341_v12, %v340_v16  ;;  %v296_v23 = vadd.f32 %v742_v13, %v1005_v62 }
 0x104   :  { %v287_v17 = vpop.f32.mrf.mxu0 }
 0x105   :  { %v360_v18 = vpack.c.bf16 %v339_v15, %v338_v14  ;;  %v288_v21 = vadd.f32 %v1005_v62, %v287_v17  ;;  %v344_v30 = vmax.f32 %v296_v23, 0.0 }
 0x106   :  { %v743_v20 = vpop.f32.mrf.mxu0 }
 0x107   :  { %v299_v22 = vadd.f32 %v743_v20, %v1005_v62  ;;  %784 = vmatprep.mubr.bf16.mxu1 %v360_v18  ;;  %v342_v28 = vmax.f32 %v288_v21, 0.0 }
 0x108   :  { %v290_v24 = vpop.f32.mrf.mxu0  ;;  %785 = vmatmul.mubr.bf16.gmra.mxu1 %v361_v19 }
 0x109   :  { %v291_v25 = vadd.f32 %v1005_v62, %v290_v24  ;;  %v345_v26 = vmax.f32 %v299_v22, 0.0 }
 0x10a   :  { %v746_v27 = vpop.f32.mrf.mxu0 }
 0x10b   :  { %v343_v29 = vmax.f32 %v291_v25, 0.0  ;;  %v363_v33 = vpack.c.bf16 %v345_v26, %v344_v30  ;;  %v312_v37 = vadd.f32 %v746_v27, %v1005_v62 }
 0x10c   :  { %v303_v31 = vpop.f32.mrf.mxu0 }
 0x10d   :  { %v362_v32 = vpack.c.bf16 %v343_v29, %v342_v28  ;;  %v304_v35 = vadd.f32 %v1005_v62, %v303_v31  ;;  %v348_v43 = vmax.f32 %v312_v37, 0.0 }
 0x10e   :  { %v747_v34 = vpop.f32.mrf.mxu0 }
 0x10f   :  { %v315_v36 = vadd.f32 %v747_v34, %v1005_v62  ;;  %788 = vmatprep.mubr.bf16.mxu1 %v362_v32  ;;  %v346_v41 = vmax.f32 %v304_v35, 0.0 }
 0x110   :  { %v306_v38 = vpop.f32.mrf.mxu0  ;;  %789 = vmatmul.mubr.bf16.gmra.mxu1 %v363_v33 }
 0x111   :  { %v307_v39 = vadd.f32 %v1005_v62, %v306_v38  ;;  %v349_v40 = vmax.f32 %v315_v36, 0.0 }
 0x113   :  { %v347_v42 = vmax.f32 %v307_v39, 0.0  ;;  %v365_v45 = vpack.c.bf16 %v349_v40, %v348_v43 }
 0x115   :  { %v364_v44 = vpack.c.bf16 %v347_v42, %v346_v41 }
 0x117   :  { %792 = vmatprep.mubr.bf16.mxu1 %v364_v44 }
 0x118   :  { %793 = vmatmul.mubr.bf16.gmra.mxu1 %v365_v45 }
 0x1a0   :  { %v766_v47 = vpop.f32.mrf.mxu0 }
 0x1a1   :  { %v480_v48 = vadd.f32 %v766_v47, %v1042_v46 }
 0x1a2   :  { %v471_v49 = vpop.f32.mrf.mxu0 }
 0x1a3   :  { %600 = vst [vmem:[%s1177_s5 + $0x10] sm:$0xff] %v480_v48  ;;  %v472_v62 = vadd.f32 %v1042_v46, %v471_v49 }
 0x1a4   :  { %v767_v50 = vpop.f32.mrf.mxu0 }
 0x1a5   :  { %598 = vst [vmem:[%s1177_s5] sm:$0xff] %v472_v62  ;;  %v483_v51 = vadd.f32 %v767_v50, %v1042_v46 }
 0x1a6   :  { %v474_v52 = vpop.f32.mrf.mxu0 }
 0x1a7   :  { %601 = vst [vmem:[%s1177_s5 + $0x18] sm:$0xff] %v483_v51  ;;  %v475_v53 = vadd.f32 %v1042_v46, %v474_v52 }
 0x1a8   :  { %v770_v54 = vpop.f32.mrf.mxu1 }
 0x1a9   :  { %599 = vst [vmem:[%s1177_s5 + $0x8] sm:$0xff] %v475_v53  ;;  %v496_v55 = vadd.f32 %v770_v54, %v1042_v46 }
 0x1aa   :  { %v487_v56 = vpop.f32.mrf.mxu1 }
 0x1ab   :  { %604 = vst [vmem:[%s1177_s5 + $0x30] sm:$0xff] %v496_v55  ;;  %v488_v57 = vadd.f32 %v1042_v46, %v487_v56 }
 0x1ac   :  { %v771_v58 = vpop.f32.mrf.mxu1 }
 0x1ad   :  { %602 = vst [vmem:[%s1177_s5 + $0x20] sm:$0xff] %v488_v57  ;;  %v499_v59 = vadd.f32 %v771_v58, %v1042_v46 }
 0x1ae   :  { %v490_v60 = vpop.f32.mrf.mxu1 }
 0x1af   :  { %605 = vst [vmem:[%s1177_s5 + $0x38] sm:$0xff] %v499_v59  ;;  %v491_v61 = vadd.f32 %v1042_v46, %v490_v60 }
 0x1b0   :  { %v774_v63 = vpop.f32.mrf.mxu1 }
 0x1b1   :  { %603 = vst [vmem:[%s1177_s5 + $0x28] sm:$0xff] %v491_v61  ;;  %v512_v0 = vadd.f32 %v774_v63, %v1042_v46 }
 0x1b2   :  { %v503_v1 = vpop.f32.mrf.mxu1 }
 0x1b3   :  { %608 = vst [vmem:[%s1177_s5 + $0x50] sm:$0xff] %v512_v0  ;;  %v504_v2 = vadd.f32 %v1042_v46, %v503_v1 }
 0x1b4   :  { %v775_v3 = vpop.f32.mrf.mxu1 }
 0x1b5   :  { %606 = vst [vmem:[%s1177_s5 + $0x40] sm:$0xff] %v504_v2  ;;  %v515_v4 = vadd.f32 %v775_v3, %v1042_v46 }
 0x1b6   :  { %v506_v5 = vpop.f32.mrf.mxu1 }
 0x1b7   :  { %609 = vst [vmem:[%s1177_s5 + $0x58] sm:$0xff] %v515_v4  ;;  %v507_v6 = vadd.f32 %v1042_v46, %v506_v5 }
 0x1b8   :  { %v778_v7 = vpop.f32.mrf.mxu1 }
 0x1b9   :  { %607 = vst [vmem:[%s1177_s5 + $0x48] sm:$0xff] %v507_v6  ;;  %v528_v8 = vadd.f32 %v778_v7, %v1042_v46 }
 0x1ba   :  { %v519_v9 = vpop.f32.mrf.mxu1 }
 0x1bb   :  { %612 = vst [vmem:[%s1177_s5 + $0x70] sm:$0xff] %v528_v8  ;;  %v520_v10 = vadd.f32 %v1042_v46, %v519_v9 }
 0x1bc   :  { %v779_v11 = vpop.f32.mrf.mxu1 }
 0x1bd   :  { %610 = vst [vmem:[%s1177_s5 + $0x60] sm:$0xff] %v520_v10  ;;  %v531_v12 = vadd.f32 %v779_v11, %v1042_v46 }
 0x1be   :  { %v522_v13 = vpop.f32.mrf.mxu1 }
 0x1bf   :  { %613 = vst [vmem:[%s1177_s5 + $0x78] sm:$0xff] %v531_v12  ;;  %v523_v14 = vadd.f32 %v1042_v46, %v522_v13 }
 0x1c0   :  { %v782_v15 = vpop.f32.mrf.mxu1 }
 0x1c1   :  { %611 = vst [vmem:[%s1177_s5 + $0x68] sm:$0xff] %v523_v14  ;;  %v544_v16 = vadd.f32 %v782_v15, %v1042_v46 }
 0x1c2   :  { %v535_v17 = vpop.f32.mrf.mxu1 }
 0x1c3   :  { %616 = vst [vmem:[%s1177_s5 + $0x90] sm:$0xff] %v544_v16  ;;  %v536_v18 = vadd.f32 %v1042_v46, %v535_v17 }
 0x1c4   :  { %v783_v19 = vpop.f32.mrf.mxu1 }
 0x1c5   :  { %614 = vst [vmem:[%s1177_s5 + $0x80] sm:$0xff] %v536_v18  ;;  %v547_v20 = vadd.f32 %v783_v19, %v1042_v46 }
 0x1c6   :  { %v538_v21 = vpop.f32.mrf.mxu1 }
 0x1c7   :  { %617 = vst [vmem:[%s1177_s5 + $0x98] sm:$0xff] %v547_v20  ;;  %v539_v22 = vadd.f32 %v1042_v46, %v538_v21 }
 0x1c8   :  { %v786_v23 = vpop.f32.mrf.mxu1 }
 0x1c9   :  { %615 = vst [vmem:[%s1177_s5 + $0x88] sm:$0xff] %v539_v22  ;;  %v560_v24 = vadd.f32 %v786_v23, %v1042_v46 }
 0x1ca   :  { %v551_v25 = vpop.f32.mrf.mxu1 }
 0x1cb   :  { %620 = vst [vmem:[%s1177_s5 + $0xb0] sm:$0xff] %v560_v24  ;;  %v552_v26 = vadd.f32 %v1042_v46, %v551_v25 }
 0x1cc   :  { %v787_v27 = vpop.f32.mrf.mxu1 }
 0x1cd   :  { %618 = vst [vmem:[%s1177_s5 + $0xa0] sm:$0xff] %v552_v26  ;;  %v563_v28 = vadd.f32 %v787_v27, %v1042_v46 }
 0x1ce   :  { %v554_v29 = vpop.f32.mrf.mxu1 }
 0x1cf   :  { %621 = vst [vmem:[%s1177_s5 + $0xb8] sm:$0xff] %v563_v28  ;;  %v555_v30 = vadd.f32 %v1042_v46, %v554_v29 }
 0x1d0   :  { %v790_v31 = vpop.f32.mrf.mxu1 }
 0x1d1   :  { %619 = vst [vmem:[%s1177_s5 + $0xa8] sm:$0xff] %v555_v30  ;;  %v576_v32 = vadd.f32 %v790_v31, %v1042_v46 }
 0x1d2   :  { %v567_v33 = vpop.f32.mrf.mxu1 }
 0x1d3   :  { %624 = vst [vmem:[%s1177_s5 + $0xd0] sm:$0xff] %v576_v32  ;;  %v568_v34 = vadd.f32 %v1042_v46, %v567_v33 }
 0x1d4   :  { %v791_v35 = vpop.f32.mrf.mxu1 }
 0x1d5   :  { %622 = vst [vmem:[%s1177_s5 + $0xc0] sm:$0xff] %v568_v34  ;;  %v579_v36 = vadd.f32 %v791_v35, %v1042_v46 }
 0x1d6   :  { %v570_v37 = vpop.f32.mrf.mxu1 }
 0x1d7   :  { %625 = vst [vmem:[%s1177_s5 + $0xd8] sm:$0xff] %v579_v36  ;;  %v571_v38 = vadd.f32 %v1042_v46, %v570_v37 }
 0x1d8   :  { %v794_v39 = vpop.f32.mrf.mxu1 }
 0x1d9   :  { %623 = vst [vmem:[%s1177_s5 + $0xc8] sm:$0xff] %v571_v38  ;;  %v592_v40 = vadd.f32 %v794_v39, %v1042_v46 }
 0x1da   :  { %v583_v41 = vpop.f32.mrf.mxu1 }
 0x1db   :  { %628 = vst [vmem:[%s1177_s5 + $0xf0] sm:$0xff] %v592_v40  ;;  %v584_v42 = vadd.f32 %v1042_v46, %v583_v41 }
 0x1dc   :  { %v795_v43 = vpop.f32.mrf.mxu1 }
 0x1dd   :  { %626 = vst [vmem:[%s1177_s5 + $0xe0] sm:$0xff] %v584_v42  ;;  %v595_v44 = vadd.f32 %v795_v43, %v1042_v46 }
 0x1de   :  { %v586_v45 = vpop.f32.mrf.mxu1 }
 0x1df   :  { %629 = vst [vmem:[%s1177_s5 + $0xf8] sm:$0xff] %v595_v44  ;;  %v587_v47 = vadd.f32 %v1042_v46, %v586_v45 }
 0x1e1   :  { %627 = vst [vmem:[%s1177_s5 + $0xe8] sm:$0xff] %v587_v47 }

</bundles_post_ra>
